<compile_context>
chip_gen: v7x
topology: tpu7x:2x2x1
jax: 0.10.0
libtpu: 0.0.40
codegen_flags: <defaults>
</compile_context>

<pallas_src>
from functools import partial

import jax
import jax.numpy as jnp
from jax.experimental import pallas as pl
from jax.experimental.pallas import tpu as pltpu


def _round_up(x, m):
    return ((x + m - 1) // m) * m


def _largest_tile_dividing(dim_p, cap=512):
    """Largest multiple of 128 <= cap that divides dim_p (dim_p % 128 == 0)."""
    t = min(cap, dim_p)
    t -= t % 128
    while t > 128 and dim_p % t != 0:
        t -= 128
    return max(t, 128)


# -----------------------------------------------------------------------------
# Kernel 1: projection  g0 = norm ⊙ (X @ W^T)        (project-first reorder)
# -----------------------------------------------------------------------------
def sgc_proj_kernel(x_ref, wt_ref, scale_ref, o_ref, acc_ref):
    ff = pl.program_id(1)

    @pl.when(ff == 0)
    def _():
        acc_ref[...] = jnp.zeros_like(acc_ref)

    acc_ref[...] += jnp.dot(x_ref[...], wt_ref[...],
                            preferred_element_type=jnp.float32)

    @pl.when(ff == pl.num_programs(1) - 1)
    def _():
        o_ref[...] = (acc_ref[...] * scale_ref[...]).astype(o_ref.dtype)


# -----------------------------------------------------------------------------
# Kernel 2: one propagation hop  o = scale ⊙ (A @ g)   (+ bias on the last hop)
#   scale = norm^2 for inner hops (keeps g pre-scaled), norm for the last hop.
# -----------------------------------------------------------------------------
def sgc_hop_kernel(*refs, use_bias, resident_h, tile_k):
    if use_bias:
        a_ref, h_ref, scale_ref, b_ref, o_ref, acc_ref = refs
    else:
        a_ref, h_ref, scale_ref, o_ref, acc_ref = refs
        b_ref = None

    kk = pl.program_id(1)

    @pl.when(kk == 0)
    def _():
        acc_ref[...] = jnp.zeros_like(acc_ref)

    if resident_h:
        # h is fully VMEM-resident: slice the reduction block out ourselves.
        start = pl.multiple_of(kk * tile_k, tile_k)
        h_blk = h_ref[pl.ds(start, tile_k), :]
    else:
        h_blk = h_ref[...]

    acc_ref[...] += jnp.dot(a_ref[...], h_blk,
                            preferred_element_type=jnp.float32)

    @pl.when(kk == pl.num_programs(1) - 1)
    def _():
        out = acc_ref[...] * scale_ref[...]
        if use_bias:
            out = out + b_ref[...]
        o_ref[...] = out.astype(o_ref.dtype)


# -----------------------------------------------------------------------------
# Driver
# -----------------------------------------------------------------------------
def sgc_forward(adj, features, weight, bias, *, k):
    """SGC forward.

    adj:      (N, N) f32 dense adjacency, A[i, j] = 1 iff edge j -> i
    features: (N, F) node features
    weight:   (C, F) nn.Linear weight (PyTorch convention)
    bias:     (C,) or None
    """
    assert k >= 1, "SGC propagation depth k must be >= 1"
    N, F = features.shape
    C = weight.shape[0]
    use_bias = bias is not None

    # DGL SGConv norm='both': norm = in_degree.clamp(min=1) ** -0.5
    in_deg = jnp.clip(jnp.sum(adj, axis=1), 1.0)
    norm = jax.lax.rsqrt(in_deg).astype(jnp.float32)

    # --- tile / padding choices ----------------------------------------------
    n128 = _round_up(N, 128)
    if n128 >= 1024:
        tile_n = 512        # fills 256-wide MXU, keeps gm >= 2
    elif n128 >= 512:
        tile_n = 256
    else:
        tile_n = 128
    Np = _round_up(n128, tile_n)        # tile_m == tile_k == tile_n, no lcm issue
    Fp = _round_up(F, 128)
    Cp = _round_up(C, 128)
    tile_f = _largest_tile_dividing(Fp, cap=512)

    gm = Np // tile_n
    gk = Np // tile_n
    gf = Fp // tile_f

    # --- padded operands (zero-padded nodes/cols contribute nothing) ----------
    a_p = jnp.zeros((Np, Np), jnp.bfloat16).at[:N, :N].set(adj.astype(jnp.bfloat16))
    x_p = jnp.zeros((Np, Fp), jnp.bfloat16).at[:N, :F].set(features.astype(jnp.bfloat16))
    wt_p = jnp.zeros((Fp, Cp), jnp.bfloat16).at[:F, :C].set(weight.T.astype(jnp.bfloat16))
    norm_p = jnp.ones((Np, 1), jnp.float32).at[:N, 0].set(norm)
    nsq_p = norm_p * norm_p
    b_p = (jnp.zeros((1, Cp), jnp.float32).at[0, :C].set(bias.astype(jnp.float32))
           if use_bias else None)

    # --- pipelining / residency decisions -------------------------------------
    resident_h = (Np * Cp * 2) <= (4 << 20)    # full bf16 h slab in VMEM
    deep = gk >= 3

    if deep:
        a_spec = pl.BlockSpec((tile_n, tile_n), lambda i, kk: (i, kk),
                              pipeline_mode=pl.Buffered(3))
    else:
        a_spec = pl.BlockSpec((tile_n, tile_n), lambda i, kk: (i, kk))

    if resident_h:
        h_spec = pl.BlockSpec((Np, Cp), lambda i, kk: (0, 0))
    elif deep and Cp > tile_n:
        # h tiles are heavier than A tiles -> deepen that stream instead.
        h_spec = pl.BlockSpec((tile_n, Cp), lambda i, kk: (kk, 0),
                              pipeline_mode=pl.Buffered(3))
    else:
        h_spec = pl.BlockSpec((tile_n, Cp), lambda i, kk: (kk, 0))

    scale_spec = pl.BlockSpec((tile_n, 1), lambda i, kk: (i, 0))
    bias_spec = pl.BlockSpec((1, Cp), lambda i, kk: (0, 0))
    out_spec = pl.BlockSpec((tile_n, Cp), lambda i, kk: (i, 0))

    # --- VMEM budget (generation-safe: <= 48 MiB, v7x physical is 64 MiB) -----
    a_buf = 3 if deep else 2
    h_bytes = (2 * Np * Cp * 2) if resident_h else (3 * tile_n * Cp * 2)
    est_hop = (a_buf * tile_n * tile_n * 2      # A tiles
               + h_bytes                        # h stream / resident slab
               + 2 * tile_n * Cp * 4            # output tiles (worst case f32)
               + tile_n * Cp * 4                # accumulator
               + 4 * tile_n * 4 + 2 * Cp * 4)   # scale + bias
    est_proj = (2 * tile_n * tile_f * 2 + 2 * tile_f * Cp * 2
                + 2 * tile_n * Cp * 2 + tile_n * Cp * 4 + 4 * tile_n * 4)
    vmem_limit = int(min(max(2 * max(est_hop, est_proj), 8 << 20), 48 << 20))

    cparams = pltpu.CompilerParams(
        dimension_semantics=("parallel", "arbitrary"),
        vmem_limit_bytes=vmem_limit)

    # --- projection: g0 = norm ⊙ (X @ W^T), bf16 out ---------------------------
    proj = pl.pallas_call(
        sgc_proj_kernel,
        out_shape=jax.ShapeDtypeStruct((Np, Cp), jnp.bfloat16),
        grid=(gm, gf),
        in_specs=[
            pl.BlockSpec((tile_n, tile_f), lambda i, f: (i, f)),
            pl.BlockSpec((tile_f, Cp), lambda i, f: (f, 0)),
            pl.BlockSpec((tile_n, 1), lambda i, f: (i, 0)),
        ],
        out_specs=pl.BlockSpec((tile_n, Cp), lambda i, f: (i, 0)),
        scratch_shapes=[pltpu.VMEM((tile_n, Cp), jnp.float32)],
        compiler_params=cparams,
    )
    g = proj(x_p, wt_p, norm_p)

    # --- k propagation hops on the (Np, Cp) matrix -----------------------------
    def make_hop(out_dtype, with_bias):
        in_specs = [a_spec, h_spec, scale_spec]
        if with_bias:
            in_specs.append(bias_spec)
        return pl.pallas_call(
            partial(sgc_hop_kernel, use_bias=with_bias,
                    resident_h=resident_h, tile_k=tile_n),
            out_shape=jax.ShapeDtypeStruct((Np, Cp), out_dtype),
            grid=(gm, gk),
            in_specs=in_specs,
            out_specs=out_spec,
            scratch_shapes=[pltpu.VMEM((tile_n, Cp), jnp.float32)],
            compiler_params=cparams,
        )

    if k > 1:
        hop_mid = make_hop(jnp.bfloat16, False)
        for _ in range(k - 1):
            g = hop_mid(a_p, g, nsq_p)

    hop_last = make_hop(jnp.float32, use_bias)
    if use_bias:
        out_p = hop_last(a_p, g, norm_p, b_p)
    else:
        out_p = hop_last(a_p, g, norm_p)

    return out_p[:N, :C].astype(features.dtype)


if __name__ == "__main__":
    # Small, deterministic synthetic problem.
    N = 16          # number of graph nodes
    in_feats = 32
    n_classes = 8
    k = 2
    use_bias = True

    key = jax.random.PRNGKey(0)
    k_adj, k_x, k_w, k_b = jax.random.split(key, 4)

    # Synthetic graph: dense random adjacency (edge j -> i), p = 0.3.
    adj = jax.random.bernoulli(k_adj, p=0.3, shape=(N, N)).astype(jnp.float32)
    features = jax.random.normal(k_x, (N, in_feats), dtype=jnp.float32)

    # Deterministic Linear(in_feats, n_classes, bias) parameters.
    weight = (jax.random.normal(k_w, (n_classes, in_feats), dtype=jnp.float32)
              * (1.0 / jnp.sqrt(in_feats)))
    bias = (jax.random.normal(k_b, (n_classes,), dtype=jnp.float32) * 0.01
            if use_bias else None)

    out = sgc_forward(adj, features, weight, bias, k=k)
    out = jax.block_until_ready(out)
    assert out.shape == (N, n_classes)

    # --- references -----------------------------------------------------------
    norm_col = jax.lax.rsqrt(jnp.clip(jnp.sum(adj, axis=1), 1.0)).reshape(N, 1)

    # Exact f32 SGC math (PyTorch/DGL semantics: propagate k times, then Linear).
    s = norm_col * adj * norm_col.T
    h_ref = features
    for _ in range(k):
        h_ref = s @ h_ref
    ref_f32 = h_ref @ weight.T + (bias if use_bias else 0.0)

    # Mirror of the kernel's project-first, bf16-operand / f32-accum strategy.
    nsq = norm_col * norm_col
    a_bf = adj.astype(jnp.bfloat16)
    g_ref = (jnp.dot(features.astype(jnp.bfloat16),
                     weight.T.astype(jnp.bfloat16),
                     preferred_element_type=jnp.float32) * norm_col
             ).astype(jnp.bfloat16)
    for _ in range(k - 1):
        g_ref = (jnp.dot(a_bf, g_ref, preferred_element_type=jnp.float32) * nsq
                 ).astype(jnp.bfloat16)
    ref_bf = jnp.dot(a_bf, g_ref, preferred_element_type=jnp.float32) * norm_col
    if use_bias:
        ref_bf = ref_bf + bias

    assert jnp.allclose(out, ref_bf, atol=2e-3, rtol=2e-3), "mismatch vs bf16 mirror"
    # bf16 operands vs pure-f32 reference: loose tolerance.
    assert jnp.allclose(out, ref_f32, atol=5e-2, rtol=5e-2), "mismatch vs f32 reference"

    print("KERNEL_OK")
</pallas_src>

<mosaic_0001>
module attributes {stable_mosaic.version = 11 : i64} {
  func.func @sgc_proj_kernel(%arg0: i32, %arg1: i32, %arg2: memref<128x128xbf16, #tpu.memory_space<vmem>>, %arg3: memref<128x128xbf16, #tpu.memory_space<vmem>>, %arg4: memref<128x1xf32, #tpu.memory_space<vmem>>, %arg5: memref<128x128xbf16, #tpu.memory_space<vmem>>, %arg6: memref<128x128xf32, #tpu.memory_space<vmem>>) attributes {dimension_semantics = [#tpu.dimension_semantics<parallel>, #tpu.dimension_semantics<arbitrary>], iteration_bounds = array<i64: 1, 1>, scalar_prefetch = 0 : i64, scratch_operands = 1 : i64, tpu.core_type = #tpu.core_type<tc>, window_params = [{transform_indices = @transform_0, window_bounds = array<i64: 128, 128>}, {transform_indices = @transform_1, window_bounds = array<i64: 128, 128>}, {transform_indices = @transform_2, window_bounds = array<i64: 128, 1>}, {transform_indices = @transform_3, window_bounds = array<i64: 128, 128>}]} {
    %c0_i32 = arith.constant 0 : i32
    %0 = arith.cmpi eq, %arg1, %c0_i32 : i32
    %1 = arith.extui %0 : i1 to i32
    %c0_i32_0 = arith.constant 0 : i32
    %2 = arith.cmpi ne, %1, %c0_i32_0 : i32
    scf.if %2 {
      %cst_10 = arith.constant 0.000000e+00 : f32
      %12 = vector.broadcast %cst_10 : f32 to vector<128x128xf32>
      %c0_11 = arith.constant 0 : index
      %c0_12 = arith.constant 0 : index
      %13 = vector.load %arg6[%c0_11, %c0_12] : memref<128x128xf32, #tpu.memory_space<vmem>>, vector<128x128xf32>
      tpu.vector_store %arg6[%c0_11, %c0_12], %12 {strides = array<i32>} : memref<128x128xf32, #tpu.memory_space<vmem>>, vector<128x128xf32>,
    } else {
    }
    %c0 = arith.constant 0 : index
    %c0_1 = arith.constant 0 : index
    %3 = vector.load %arg6[%c0, %c0_1] : memref<128x128xf32, #tpu.memory_space<vmem>>, vector<128x128xf32>
    %c0_2 = arith.constant 0 : index
    %c0_3 = arith.constant 0 : index
    %4 = vector.load %arg2[%c0_2, %c0_3] : memref<128x128xbf16, #tpu.memory_space<vmem>>, vector<128x128xbf16>
    %c0_4 = arith.constant 0 : index
    %c0_5 = arith.constant 0 : index
    %5 = vector.load %arg3[%c0_4, %c0_5] : memref<128x128xbf16, #tpu.memory_space<vmem>>, vector<128x128xbf16>
    %cst = arith.constant dense<0.000000e+00> : vector<128x128xf32>
    %6 = tpu.matmul %4, %5, %cst {dimension_numbers = #tpu.dot_dimension_numbers<[1], [0], [0], [1], [0, 0, 1, 1], [], []>} : vector<128x128xbf16>, vector<128x128xbf16>, vector<128x128xf32> -> vector<128x128xf32>
    %7 = arith.addf %3, %6 : vector<128x128xf32>
    %c0_6 = arith.constant 0 : index
    %c0_7 = arith.constant 0 : index
    %8 = vector.load %arg6[%c0_6, %c0_7] : memref<128x128xf32, #tpu.memory_space<vmem>>, vector<128x128xf32>
    tpu.vector_store %arg6[%c0_6, %c0_7], %7 {strides = array<i32>} : memref<128x128xf32, #tpu.memory_space<vmem>>, vector<128x128xf32>,
    %c0_i32_8 = arith.constant 0 : i32
    %9 = arith.cmpi eq, %arg1, %c0_i32_8 : i32
    %10 = arith.extui %9 : i1 to i32
    %c0_i32_9 = arith.constant 0 : i32
    %11 = arith.cmpi ne, %10, %c0_i32_9 : i32
    scf.if %11 {
      %c0_10 = arith.constant 0 : index
      %c0_11 = arith.constant 0 : index
      %12 = vector.load %arg6[%c0_10, %c0_11] : memref<128x128xf32, #tpu.memory_space<vmem>>, vector<128x128xf32>
      %c0_12 = arith.constant 0 : index
      %c0_13 = arith.constant 0 : index
      %13 = vector.load %arg4[%c0_12, %c0_13] : memref<128x1xf32, #tpu.memory_space<vmem>>, vector<128x1xf32>
      %14 = vector.broadcast %13 : vector<128x1xf32> to vector<128x128xf32>
      %15 = arith.mulf %12, %14 : vector<128x128xf32>
      %16 = arith.truncf %15 : vector<128x128xf32> to vector<128x128xbf16>
      %c0_14 = arith.constant 0 : index
      %c0_15 = arith.constant 0 : index
      %17 = vector.load %arg5[%c0_14, %c0_15] : memref<128x128xbf16, #tpu.memory_space<vmem>>, vector<128x128xbf16>
      tpu.vector_store %arg5[%c0_14, %c0_15], %16 {strides = array<i32>} : memref<128x128xbf16, #tpu.memory_space<vmem>>, vector<128x128xbf16>,
    } else {
    }
    return
  }
  func.func @transform_0(%arg0: i32, %arg1: i32) -> (i32, i32) {
    %c0_i32 = arith.constant 0 : i32
    return %arg0, %arg1 : i32, i32
  }
  func.func @transform_1(%arg0: i32, %arg1: i32) -> (i32, i32) {
    %c0_i32 = arith.constant 0 : i32
    %c0_i32_0 = arith.constant 0 : i32
    return %arg1, %c0_i32 : i32, i32
  }
  func.func @transform_2(%arg0: i32, %arg1: i32) -> (i32, i32) {
    %c0_i32 = arith.constant 0 : i32
    %c0_i32_0 = arith.constant 0 : i32
    return %arg0, %c0_i32 : i32, i32
  }
  func.func @transform_3(%arg0: i32, %arg1: i32) -> (i32, i32) {
    %c0_i32 = arith.constant 0 : i32
    %c0_i32_0 = arith.constant 0 : i32
    return %arg0, %c0_i32 : i32, i32
  }
}

</mosaic_0001>

<bundles_post_ra>
// kernel: tpu_custom_call.1
= control target key start
LH: loop header
LB: loop body
LE: loop exit
PB: predicated region body
PF: predicated region fallthrough
CT: control target
= control target key end

     0   :  { %v741_v2 = vmov 0   ;;  %s873_s0 = inlined_call_operand.vmem [shape: bf16[128,128], index: 0, kind: input, shape index: {}]   ;;  %s874_s1 = inlined_call_operand.vmem [shape: bf16[128,128], index: 1, kind: input, shape index: {}]   ;;  %s875_s2 = inlined_call_operand.vmem [shape: f32[128,1], index: 2, kind: input, shape index: {}]   ;;  %s876_s3 = inlined_call_operand.hbm [shape: bf16[128,128], index: 3, kind: output, shape index: {}]  }
   0x1   :  { %v701_v0 = vld [vmem:[%s874_s1] sm:$0xff]   ;;  %v702_v1 = vld [vmem:[%s874_s1 + $0x8] sm:$0xff]   ;;  %700 = vset.pattern.permute.xlu1 %v741_v2  ;;  %699 = vset.pattern.permute.xlu0 %v741_v2  ;;  %v703_v3 = vld [vmem:[%s874_s1 + $0x10] sm:$0xff]  }
   0x2   :  { %647 = vmatprep.subr.bf16.mxu0 %v701_v0  ;;  %679 = vmatprep.subr.bf16.mxu1 %v701_v0  ;;  %v704_v4 = vld [vmem:[%s874_s1 + $0x18] sm:$0xff]   ;;  %v709_v5 = vld [vmem:[%s873_s0] sm:$0xff]   ;;  %v706_v8 = vld [vmem:[%s874_s1 + $0x28] sm:$0xff]  }
   0x3   :  { %648 = vmatpush3.bf16.msra.mxu0 %v701_v0  ;;  %687 = vmatpush3.bf16.msra.mxu1 %v701_v0  ;;  %v710_v6 = vld [vmem:[%s873_s0 + $0x20] sm:$0xff]   ;;  %v330_v9 = vld [vmem:[%s875_s2 + $0x10] sm:$0xff]  ;;  %v331_v11 = vld [vmem:[%s875_s2 + $0x18] sm:$0xff] }
   0x4   :  { %649 = vmatprep.subr.bf16.mxu0 %v702_v1  ;;  %680 = vmatprep.subr.bf16.mxu1 %v702_v1  ;;  %v705_v7 = vld [vmem:[%s874_s1 + $0x20] sm:$0xff]   ;;  %v329_v12 = vld [vmem:[%s875_s2 + $0x8] sm:$0xff]  ;;  %v707_v13 = vld [vmem:[%s874_s1 + $0x30] sm:$0xff]  }
   0x5   :  { %663 = vmatprep.mubr.bf16.mxu0 %v709_v5  ;;  %671 = vmatprep.mubr.bf16.mxu1 %v710_v6  ;;  %v328_v10 = vld [vmem:[%s875_s2] sm:$0xff] }
   0x6   :  { %356 = vperm.xlu1 %700, %v330_v9   ;;  %346 = vperm.xlu0 %699, %v328_v10  }
   0x7   :  { %650 = vmatpush3.bf16.msra.mxu0 %v702_v1  ;;  %688 = vmatpush3.bf16.msra.mxu1 %v702_v1 }
   0x8   :  { %651 = vmatprep.subr.bf16.mxu0 %v703_v3  ;;  %681 = vmatprep.subr.bf16.mxu1 %v703_v3 }
   0xa   :  { %361 = vperm.xlu1 %700, %v331_v11   ;;  %351 = vperm.xlu0 %699, %v329_v12  }
   0xb   :  { %652 = vmatpush3.bf16.msra.mxu0 %v703_v3  ;;  %689 = vmatpush3.bf16.msra.mxu1 %v703_v3 }
   0xc   :  { %653 = vmatprep.subr.bf16.mxu0 %v704_v4  ;;  %682 = vmatprep.subr.bf16.mxu1 %v704_v4 }
   0xf   :  { %654 = vmatpush3.bf16.msra.mxu0 %v704_v4  ;;  %690 = vmatpush3.bf16.msra.mxu1 %v704_v4 }
  0x10   :  { %655 = vmatprep.subr.bf16.mxu0 %v705_v7  ;;  %683 = vmatprep.subr.bf16.mxu1 %v705_v7 }
  0x13   :  { %656 = vmatpush3.bf16.msra.mxu0 %v705_v7  ;;  %691 = vmatpush3.bf16.msra.mxu1 %v705_v7 }
  0x14   :  { %657 = vmatprep.subr.bf16.mxu0 %v706_v8  ;;  %684 = vmatprep.subr.bf16.mxu1 %v706_v8 }
  0x15   :  { %8 = vsyncpa [#allocation4], 0  ;;  %v333_v14 = vld [vmem:[%s875_s2 + $0x28] sm:$0xff]  ;;  %v332_v15 = vld [vmem:[%s875_s2 + $0x20] sm:$0xff] }
  0x16   :  { %v708_v16 = vld [vmem:[%s874_s1 + $0x38] sm:$0xff]   ;;  %371 = vperm.xlu1 %700, %v333_v14   ;;  %366 = vperm.xlu0 %699, %v332_v15   ;;  %v334_v18 = vld [vmem:[%s875_s2 + $0x30] sm:$0xff]  ;;  %v711_v19 = vld [vmem:[%s873_s0 + $0x8] sm:$0xff]  }
  0x17   :  { %658 = vmatpush3.bf16.msra.mxu0 %v706_v8  ;;  %692 = vmatpush3.bf16.msra.mxu1 %v706_v8  ;;  %v335_v17 = vld [vmem:[%s875_s2 + $0x38] sm:$0xff]  ;;  %v712_v20 = vld [vmem:[%s873_s0 + $0x28] sm:$0xff]   ;;  %v336_v22 = vld [vmem:[%s875_s2 + $0x40] sm:$0xff] }
  0x18   :  { %659 = vmatprep.subr.bf16.mxu0 %v707_v13  ;;  %685 = vmatprep.subr.bf16.mxu1 %v707_v13  ;;  %v337_v21 = vld [vmem:[%s875_s2 + $0x48] sm:$0xff]  ;;  %v713_v23 = vld [vmem:[%s873_s0 + $0x10] sm:$0xff]   ;;  %v339_v25 = vld [vmem:[%s875_s2 + $0x58] sm:$0xff] }
  0x19   :  { %v714_v24 = vld [vmem:[%s873_s0 + $0x30] sm:$0xff]   ;;  %v715_v27 = vld [vmem:[%s873_s0 + $0x18] sm:$0xff]   ;;  %v341_v29 = vld [vmem:[%s875_s2 + $0x68] sm:$0xff] }
  0x1a   :  { %381 = vperm.xlu1 %700, %v335_v17   ;;  %376 = vperm.xlu0 %699, %v334_v18   ;;  %v338_v26 = vld [vmem:[%s875_s2 + $0x50] sm:$0xff]  ;;  %v716_v28 = vld [vmem:[%s873_s0 + $0x38] sm:$0xff]   ;;  %v340_v30 = vld [vmem:[%s875_s2 + $0x60] sm:$0xff]  ;;  %s742_s0 = smov [#allocation3]  }
  0x1b   :  { %660 = vmatpush3.bf16.msra.mxu0 %v707_v13  ;;  %693 = vmatpush3.bf16.msra.mxu1 %v707_v13  ;;  %v343_v31 = vld [vmem:[%s875_s2 + $0x78] sm:$0xff]  ;;  %v342_v32 = vld [vmem:[%s875_s2 + $0x70] sm:$0xff]  ;;  %s525_s2 = sshll.u32 %s742_s0, 4  ;;  %s526_s2 = int_to_ptr.vmem [resolvable:$true] %s525_s2 }
  0x1c   :  { %661 = vmatprep.subr.bf16.mxu0 %v708_v16  ;;  %686 = vmatprep.subr.bf16.mxu1 %v708_v16  ;;  %s717_s21 = scalar_lea.vmem %s526_s2, 1024  ;;  %p722_p1 = scmp.lt.s32.totalorder %s526_s2, %s526_s2 }
  0x1d   :  { %p718_p0 = scmp.ne.s32.totalorder %s526_s2, %s717_s21  ;;  %p723_p2 = scmp.lt.s32.totalorder %s717_s21, %s717_s21 }
  0x1e   :  { %391 = vperm.xlu1 %700, %v337_v21   ;;  %386 = vperm.xlu0 %699, %v336_v22  }
  0x1f   :  { %662 = vmatpush3.bf16.msra.mxu0 %v708_v16  ;;  %694 = vmatpush3.bf16.msra.mxu1 %v708_v16  ;;  %p724_p3 = por %p723_p2, %p722_p1 }
  0x21   :  { %p725_p4 = pnand %p724_p3, %p718_p0 }
  0x22   :  { %664 = vmatmul.mubr.bf16.vlgmr.msra.gmra.mrb[0].mxu0 %v711_v19  ;;  %672 = vmatmul.mubr.bf16.vlgmr.msra.gmra.mrb[0].mxu1 %v712_v20 }
  0x23   :  { %667 = vmatprep.mubr.bf16.mxu0 %v713_v23  ;;  %675 = vmatprep.mubr.bf16.mxu1 %v714_v24 }
  0x24   :  { %401 = vperm.xlu1 %700, %v339_v25   ;;  %396 = vperm.xlu0 %699, %v338_v26  }
  0x28   :  { %411 = vperm.xlu1 %700, %v341_v29   ;;  %406 = vperm.xlu0 %699, %v340_v30  }
  0x2a   :  { %668 = vmatmul.mubr.bf16.gmra.mrb[4].mxu0 %v715_v27  ;;  %676 = vmatmul.mubr.bf16.gmra.mrb[4].mxu1 %v716_v28 }
  0x2c   :  { %421 = vperm.xlu1 %700, %v343_v31   ;;  %416 = vperm.xlu0 %699, %v342_v32  }
  0x85   :  { %v357_v33 = vpop.permute.xlu1 %356  ;;  %v347_v34 = vpop.permute.xlu0 %346 }
  0x89   :  { %v362_v35 = vpop.permute.xlu1 %361  ;;  %v352_v36 = vpop.permute.xlu0 %351 }
  0x95   :  { %v372_v37 = vpop.permute.xlu1 %371  ;;  %v367_v38 = vpop.permute.xlu0 %366 }
  0x99   :  { %v382_v39 = vpop.permute.xlu1 %381  ;;  %v377_v40 = vpop.permute.xlu0 %376 }
  0x9d   :  { %v392_v41 = vpop.permute.xlu1 %391  ;;  %v387_v42 = vpop.permute.xlu0 %386 }
  0xa3   :  { %v402_v43 = vpop.permute.xlu1 %401  ;;  %v397_v44 = vpop.permute.xlu0 %396 }
  0xa7   :  { %v412_v45 = vpop.permute.xlu1 %411  ;;  %v407_v46 = vpop.permute.xlu0 %406 }
  0xab   :  { %v422_v3 = vpop.permute.xlu1 %421  ;;  %v417_v4 = vpop.permute.xlu0 %416 }
  0xf5   :  { %v665_v47 = vpop.f32.mrb[0].mxu0  ;;  %v673_v48 = vpop.f32.mrb[0].mxu1 }
  0xf6   :  { %v214_v49 = vpop.f32.mrb[1].mxu0  ;;  %v246_v50 = vpop.f32.mrb[1].mxu1  ;;  %v426_v53 = vmul.f32 %v665_v47, %v357_v33  ;;  %v434_v54 = vmul.f32 %v673_v48, %v397_v44 }
  0xf7   :  { %v666_v51 = vpop.f32.mrb[2].mxu0  ;;  %v674_v52 = vpop.f32.mrb[2].mxu1  ;;  %v424_v59 = vmul.f32 %v347_v34, %v214_v49  ;;  %v432_v60 = vmul.f32 %v387_v42, %v246_v50 }
  0xf8   :  { %v427_v55 = vmul.f32 %v666_v51, %v362_v35  ;;  %v435_v56 = vmul.f32 %v674_v52, %v402_v43  ;;  %v217_v57 = vpop.f32.mrb[3].mxu0  ;;  %v249_v58 = vpop.f32.mrb[3].mxu1 }
  0xf9   :  { %v425_v61 = vmul.f32 %v352_v36, %v217_v57  ;;  %v433_v62 = vmul.f32 %v392_v41, %v249_v58 }
  0xfa   :  { %v592_v63 = vpack.c.bf16 %v427_v55, %v426_v53  ;;  %v612_v0 = vpack.c.bf16 %v435_v56, %v434_v54 }
  0xfb   :  { %v587_v1 = vpack.c.bf16 %v425_v61, %v424_v59  ;;  %v607_v2 = vpack.c.bf16 %v433_v62, %v432_v60 }
  0xfc   :  { %624 = vst [vmem:[#allocation3 + $0x8] sm:$0xff] %v592_v63   ;;  %628 = vst [vmem:[#allocation3 + $0x28] sm:$0xff] %v612_v0  }
  0xfd   :  { %588 = vst [vmem:[#allocation3] sm:$0xff] %v587_v1   ;;  %627 = vst [vmem:[#allocation3 + $0x20] sm:$0xff] %v607_v2   ;;  %v669_v5 = vpop.f32.mrb[4].mxu0  ;;  %v677_v6 = vpop.f32.mrb[4].mxu1 }
  0xfe   :  { %v230_v7 = vpop.f32.mrb[5].mxu0  ;;  %v262_v8 = vpop.f32.mrb[5].mxu1  ;;  %v430_v11 = vmul.f32 %v669_v5, %v377_v40  ;;  %v438_v12 = vmul.f32 %v677_v6, %v417_v4 }
  0xff   :  { %v670_v9 = vpop.f32.mrb[6].mxu0  ;;  %v678_v10 = vpop.f32.mrb[6].mxu1  ;;  %v428_v17 = vmul.f32 %v367_v38, %v230_v7  ;;  %v436_v18 = vmul.f32 %v407_v46, %v262_v8 }
 0x100   :  { %v431_v13 = vmul.f32 %v670_v9, %v382_v39  ;;  %v439_v14 = vmul.f32 %v678_v10, %v422_v3  ;;  %v233_v15 = vpop.f32.mrb[7].mxu0  ;;  %v265_v16 = vpop.f32.mrb[7].mxu1 }
 0x101   :  { %v429_v19 = vmul.f32 %v372_v37, %v233_v15  ;;  %v437_v20 = vmul.f32 %v412_v45, %v265_v16 }
 0x102   :  { %v602_v21 = vpack.c.bf16 %v431_v13, %v430_v11  ;;  %v622_v22 = vpack.c.bf16 %v439_v14, %v438_v12 }
 0x103   :  { %v597_v23 = vpack.c.bf16 %v429_v19, %v428_v17  ;;  %v617_v24 = vpack.c.bf16 %v437_v20, %v436_v18 }
 0x104   :  { %626 = vst [vmem:[#allocation3 + $0x18] sm:$0xff] %v602_v21   ;;  %630 = vst [vmem:[#allocation3 + $0x38] sm:$0xff] %v622_v22  }
 0x105   :  { %625 = vst [vmem:[#allocation3 + $0x10] sm:$0xff] %v597_v23   ;;  %629 = vst [vmem:[#allocation3 + $0x30] sm:$0xff] %v617_v24  }
 0x106   :  { %728 = shalt.err (!%p725_p4)
}
 0x107   :  { %s729_s23 = scalar_lea.hbm %s876_s3, 1024 }
 0x108   :  { %p730_p5 = scmp.ne.s32.totalorder %s876_s3, %s729_s23  ;;  %p733_p6 = scmp.lt.u32.totalorder %s729_s23, %s876_s3 }
 0x10a   :  { %p735_p7 = pnand %p733_p6, %p730_p5 }
 0x10c   :  { %738 = shalt.err (!%p735_p7)
}
 0x10d   :  { %s743_s28 = smov 64   ;;  %s744_s29 = smov 4  }
 0x10e   :  { %531 = dma.vmem_to_hbm [thread:$0]  %s526_s2, 1024, %s876_s3, [#allocation4], %s743_s28, %s743_s28, %s744_s29  }
 0x10f   :  { %739 = dma.done.wait [#allocation4], 1024  }
 0x110   :  { %740 = vsyncadd [#allocation4], 4294966272 }
 0x111   :  { %535 = vsyncpa [#allocation4], 1 }

</bundles_post_ra>
